<compile_context>
chip_gen: v7x
topology: tpu7x:2x2x1
jax: 0.10.0
libtpu: 0.0.40
codegen_flags: <defaults>
</compile_context>

<pallas_src>
import functools
import math

import jax
import jax.numpy as jnp
from jax.experimental import pallas as pl
from jax.experimental.pallas import tpu as pltpu

BN_EPS = 1e-5


# ----------------------------------------------------------------------------
# Kernel bodies
# ----------------------------------------------------------------------------
def _ghost_bn(h, gamma, beta, n_vb, vbs):
    """Training-mode ghost BatchNorm, single-pass stats, folded into one FMA."""
    rows, d = h.shape
    h3 = h.reshape(n_vb, vbs, d)
    inv_n = 1.0 / float(vbs)
    mean = jnp.sum(h3, axis=1, keepdims=True) * inv_n
    ex2 = jnp.sum(h3 * h3, axis=1, keepdims=True) * inv_n
    var = ex2 - mean * mean                      # biased variance (f32)
    scale = gamma * jax.lax.rsqrt(var + BN_EPS)  # [n_vb, 1, d]
    shift = beta - mean * scale
    return (h3 * scale + shift).reshape(rows, d)


def _gate(b, approx):
    if approx:
        # exp and approx reciprocal both run on the EUP slot (off the VPU);
        # only used on the low-precision (bf16 MXU input) path.
        return pl.reciprocal(1.0 + jnp.exp(-b), approx=True)
    return jax.nn.sigmoid(b)


def _store_out(out_ref, out, slab_lanes):
    rows, d = out.shape
    if slab_lanes is not None:
        # Lane-dense slab: unmasked 128-lane stores even when d < 128.
        out = out.reshape((rows * d) // slab_lanes, slab_lanes)
    out_ref[...] = out.astype(out_ref.dtype)


def _glu_kernel_fused(x_ref, w_ref, g_ref, b_ref, out_ref, *,
                      n_vb, vbs, d_out, approx_gate, slab_lanes):
    """One grid step = n_vb ghost batches of vbs rows; single fused matmul."""
    x = x_ref[...]
    h = jnp.dot(x, w_ref[...], preferred_element_type=jnp.float32)
    hn = _ghost_bn(h, g_ref[...], b_ref[...], n_vb, vbs)
    out = hn[:, :d_out] * _gate(hn[:, d_out:], approx_gate)
    _store_out(out_ref, out, slab_lanes)


def _glu_kernel_split(x_ref, wa_ref, wb_ref, ga_ref, gb_ref, ba_ref, bb_ref,
                      out_ref, *, n_vb, vbs, d_out, approx_gate, slab_lanes):
    """Pre-split GLU halves (used when the fused post-matmul split would be a
    non-lane-aligned slice on a wide tile)."""
    del d_out
    x = x_ref[...]
    ha = jnp.dot(x, wa_ref[...], preferred_element_type=jnp.float32)
    hb = jnp.dot(x, wb_ref[...], preferred_element_type=jnp.float32)
    a = _ghost_bn(ha, ga_ref[...], ba_ref[...], n_vb, vbs)
    b = _ghost_bn(hb, gb_ref[...], bb_ref[...], n_vb, vbs)
    _store_out(out_ref, a * _gate(b, approx_gate), slab_lanes)


# ----------------------------------------------------------------------------
# Tiling helpers
# ----------------------------------------------------------------------------
def _choose_chunks_per_tile(batch, vbs, sublane, target_rows, min_even_rows=256):
    """Largest sublane-aligned number of ghost batches per grid step that fits
    the row budget; prefers an even number of grid steps (v7x dual-TC)."""
    n_chunks = batch // vbs
    divisors = [d for d in range(1, n_chunks + 1) if n_chunks % d == 0]

    def aligned(d):
        rows = d * vbs
        return rows == batch or rows % sublane == 0

    aligned_divs = [d for d in divisors if aligned(d)]  # always contains n_chunks
    fitting = [d for d in aligned_divs if d * vbs <= target_rows]
    if not fitting:
        # Hardened fallback: smallest aligned tile (never blow the VMEM budget).
        return min(aligned_divs)
    best = max(fitting)
    if (n_chunks // best) % 2 != 0:
        # v7x: an odd grid length leaves one TensorCore idle for a whole tile.
        even = [d for d in fitting
                if (n_chunks // d) % 2 == 0 and d * vbs >= min_even_rows]
        if even:
            best = max(even)
    return best


# ----------------------------------------------------------------------------
# Wrapper
# ----------------------------------------------------------------------------
_LANE_DENSE_OK = None  # probed once: can Mosaic lower the slab relayout?


def glu_layer_pallas(x, w, gamma, beta, *, output_dim, virtual_batch_size,
                     compute_dtype="auto", lane_dense_out=None,
                     target_rows=2048, vmem_limit_bytes=None):
    """x: [B, D_in], w: [D_in, 2*D_out] (pre-transposed torch Linear weight),
    gamma/beta: [1, 2*D_out]  ->  [B, D_out]."""
    global _LANE_DENSE_OK

    batch, d_in = x.shape
    two_d_out = w.shape[1]
    assert two_d_out == 2 * output_dim
    assert gamma.shape[-1] == two_d_out and beta.shape[-1] == two_d_out

    # torch.chunk with vbs >= batch is a single chunk over the whole batch.
    vbs = min(virtual_batch_size, batch)
    # TODO(synk): torch.chunk allows a ragged final virtual batch; here the
    # batch must divide evenly into virtual batches.
    assert batch % vbs == 0, "batch must divide evenly by virtual_batch_size"
    n_chunks = batch // vbs
    assert vbs % 8 == 0 or n_chunks == 1, (
        "virtual_batch_size must be a multiple of 8 unless it covers the whole "
        "batch (in-kernel per-chunk reshape needs sublane alignment)")

    out_dtype = x.dtype
    if compute_dtype == "auto":
        # Memory-bound kernel: default to bf16 MXU inputs when given f32.
        compute_dtype = jnp.bfloat16 if x.dtype == jnp.float32 else None
    if compute_dtype is not None and x.dtype != jnp.dtype(compute_dtype):
        x = x.astype(compute_dtype)
        w = w.astype(compute_dtype)
    approx_gate = jnp.dtype(x.dtype) != jnp.dtype(jnp.float32)

    gamma32 = gamma.reshape(1, two_d_out).astype(jnp.float32)
    beta32 = beta.reshape(1, two_d_out).astype(jnp.float32)

    # Fuse the two GLU half-matmuls when the post-matmul split stays cheap:
    # lane-aligned halves, or the fused N fits a single MXU output pass.
    fused = (output_dim % 128 == 0) or (two_d_out <= 256)
    if not fused:
        w_a, w_b = w[:, :output_dim], w[:, output_dim:]
        g_a, g_b = gamma32[:, :output_dim], gamma32[:, output_dim:]
        b_a, b_b = beta32[:, :output_dim], beta32[:, output_dim:]

    # --- Generation-aware VMEM budget & row-tile sizing ----------------------
    x_itemsize = jnp.dtype(x.dtype).itemsize
    out_itemsize = jnp.dtype(out_dtype).itemsize
    sublane = max(8, 32 // x_itemsize)          # 8 for f32 tiles, 16 for bf16

    try:
        vmem_capacity = int(pltpu.get_tpu_info().vmem_capacity_bytes)
    except Exception:
        vmem_capacity = 64 * 1024 * 1024        # conservative (v7x-sized)
    # ~56 MiB on 128-MiB chips (v5e/v6e), ~24 MiB on 64-MiB chips (v7x).
    budget = max(16 << 20, min(56 << 20, vmem_capacity // 2 - (8 << 20)))

    bytes_per_row = (3 * d_in * x_itemsize              # up-to-triple-buffered x
                     + 2 * output_dim * out_itemsize    # double-buffered out
                     + 12 * output_dim * 4)             # f32 h / BN / GLU temps
    weight_bytes = 2 * d_in * two_d_out * x_itemsize + 4 * two_d_out * 4
    row_cap = max(vbs, (budget - weight_bytes) // max(bytes_per_row, 1))
    target = max(vbs, min(target_rows, row_cap))

    chunks_per_tile = _choose_chunks_per_tile(batch, vbs, sublane, target)
    row_tile = chunks_per_tile * vbs
    n_tiles = n_chunks // chunks_per_tile
    x_buffers = 3 if n_tiles >= 3 else 2        # hide exposed x DMA when deep

    if vmem_limit_bytes is None:
        est = (x_buffers * row_tile * d_in * x_itemsize
               + 2 * row_tile * output_dim * out_itemsize
               + weight_bytes
               + 12 * row_tile * output_dim * 4)
        vmem_limit_bytes = int(min(max(vmem_capacity - (4 << 20), 16 << 20),
                                   max(32 << 20, est + est // 2 + (4 << 20))))

    # --- Lane-dense output slab (unmasked 128-lane stores for small D_out) ---
    out_sublane = max(8, 32 // out_itemsize)
    slab_feasible = (
        output_dim % 128 != 0
        and (row_tile * output_dim) % 128 == 0
        and (n_tiles == 1 or ((row_tile * output_dim) // 128) % out_sublane == 0))
    if lane_dense_out is None:
        want_slab = slab_feasible and _LANE_DENSE_OK is not False
        probe = want_slab and _LANE_DENSE_OK is None
    else:
        want_slab = bool(lane_dense_out) and slab_feasible
        probe = False

    def build_and_run(use_slab):
        slab_lanes = 128 if use_slab else None
        if use_slab:
            out_struct = jax.ShapeDtypeStruct(
                ((batch * output_dim) // 128, 128), out_dtype)
            out_spec = pl.BlockSpec(((row_tile * output_dim) // 128, 128),
                                    lambda i: (i, 0))
        else:
            out_struct = jax.ShapeDtypeStruct((batch, output_dim), out_dtype)
            out_spec = pl.BlockSpec((row_tile, output_dim), lambda i: (i, 0))

        x_kwargs = ({"pipeline_mode": pl.Buffered(x_buffers)}
                    if x_buffers != 2 else {})
        x_spec = pl.BlockSpec((row_tile, d_in), lambda i: (i, 0), **x_kwargs)

        common = dict(n_vb=chunks_per_tile, vbs=vbs, d_out=output_dim,
                      approx_gate=approx_gate, slab_lanes=slab_lanes)
        if fused:
            kernel = functools.partial(_glu_kernel_fused, **common)
            in_specs = [x_spec,
                        pl.BlockSpec((d_in, two_d_out), lambda i: (0, 0)),
                        pl.BlockSpec((1, two_d_out), lambda i: (0, 0)),
                        pl.BlockSpec((1, two_d_out), lambda i: (0, 0))]
            operands = (x, w, gamma32, beta32)
        else:
            kernel = functools.partial(_glu_kernel_split, **common)
            in_specs = [x_spec,
                        pl.BlockSpec((d_in, output_dim), lambda i: (0, 0)),
                        pl.BlockSpec((d_in, output_dim), lambda i: (0, 0)),
                        pl.BlockSpec((1, output_dim), lambda i: (0, 0)),
                        pl.BlockSpec((1, output_dim), lambda i: (0, 0)),
                        pl.BlockSpec((1, output_dim), lambda i: (0, 0)),
                        pl.BlockSpec((1, output_dim), lambda i: (0, 0))]
            operands = (x, w_a, w_b, g_a, g_b, b_a, b_b)

        out = pl.pallas_call(
            kernel,
            out_shape=out_struct,
            grid_spec=pltpu.PrefetchScalarGridSpec(
                num_scalar_prefetch=0,
                grid=(n_tiles,),
                in_specs=in_specs,
                out_specs=out_spec),
            compiler_params=pltpu.CompilerParams(
                dimension_semantics=("parallel",),
                vmem_limit_bytes=vmem_limit_bytes),
        )(*operands)
        if use_slab:
            out = out.reshape(batch, output_dim)
        return out

    if probe:
        try:
            out = jax.block_until_ready(build_and_run(True))
            _LANE_DENSE_OK = True
            return out
        except Exception:
            # TODO(synk): this toolchain cannot lower the in-kernel
            # [rows, D_out] -> [rows*D_out/128, 128] relayout; fall back to the
            # direct (masked-store) output layout.
            _LANE_DENSE_OK = False
            return build_and_run(False)
    return build_and_run(want_slab)


# ----------------------------------------------------------------------------
# Pure-JAX reference (training-mode ghost BN), true-f32 matmul
# ----------------------------------------------------------------------------
def glu_layer_reference(x, w, gamma, beta, *, output_dim, virtual_batch_size):
    h = jnp.dot(x.astype(jnp.float32), w.astype(jnp.float32),
                precision=jax.lax.Precision.HIGHEST)
    batch = h.shape[0]
    vbs = min(virtual_batch_size, batch)
    n_chunks = batch // vbs
    chunks = []
    for c in range(n_chunks):
        hc = h[c * vbs:(c + 1) * vbs]
        mean = jnp.mean(hc, axis=0, keepdims=True)
        var = jnp.mean((hc - mean) ** 2, axis=0, keepdims=True)   # biased
        chunks.append((hc - mean) / jnp.sqrt(var + BN_EPS) * gamma + beta)
    hn = jnp.concatenate(chunks, axis=0)
    return hn[:, :output_dim] * jax.nn.sigmoid(hn[:, output_dim:])


if __name__ == "__main__":
    # Small shapes consistent with the module.
    batch = 16
    input_dim = 32
    output_dim = 16
    virtual_batch_size = 8            # 2 ghost batches of 8 rows

    key = jax.random.PRNGKey(0)
    kx, kw = jax.random.split(key)
    x = jax.random.normal(kx, (batch, input_dim), dtype=jnp.float32)

    two_d_out = 2 * output_dim
    # xavier_normal_ with the GLU gain used by initialize_glu().
    gain = math.sqrt((input_dim + two_d_out) / math.sqrt(input_dim))
    std = gain * math.sqrt(2.0 / (input_dim + two_d_out))
    # torch Linear weight is [2*D_out, D_in]; stored pre-transposed here.
    w = std * jax.random.normal(kw, (input_dim, two_d_out), dtype=jnp.float32)

    # BatchNorm1d affine parameters at their default init.
    gamma = jnp.ones((1, two_d_out), dtype=jnp.float32)
    beta = jnp.zeros((1, two_d_out), dtype=jnp.float32)

    ref = glu_layer_reference(x, w, gamma, beta, output_dim=output_dim,
                              virtual_batch_size=virtual_batch_size)

    # Full-f32 MXU path: f32-class accuracy (a bf16 MXU path would be ~1e-2).
    out_f32 = glu_layer_pallas(x, w, gamma, beta, output_dim=output_dim,
                               virtual_batch_size=virtual_batch_size,
                               compute_dtype=jnp.float32)
    out_f32 = jax.block_until_ready(out_f32)
    assert out_f32.shape == (batch, output_dim)
    assert jnp.allclose(out_f32, ref, atol=5e-4, rtol=5e-4)

    # Default path (bf16 MXU inputs, f32 BN/GLU elementwise): loose check.
    out_def = glu_layer_pallas(x, w, gamma, beta, output_dim=output_dim,
                               virtual_batch_size=virtual_batch_size)
    out_def = jax.block_until_ready(out_def)
    assert out_def.shape == (batch, output_dim)
    assert jnp.allclose(out_def, ref, atol=5e-2, rtol=5e-2)

    print("KERNEL_OK")
</pallas_src>

<mosaic_0001>
module attributes {stable_mosaic.version = 11 : i64} {
  func.func @_glu_kernel_fused(%arg0: i32, %arg1: memref<16x32xf32, #tpu.memory_space<vmem>>, %arg2: memref<32x32xf32, #tpu.memory_space<vmem>>, %arg3: memref<1x32xf32, #tpu.memory_space<vmem>>, %arg4: memref<1x32xf32, #tpu.memory_space<vmem>>, %arg5: memref<2x128xf32, #tpu.memory_space<vmem>>) attributes {dimension_semantics = [#tpu.dimension_semantics<parallel>], iteration_bounds = array<i64: 1>, scalar_prefetch = 0 : i64, scratch_operands = 0 : i64, tpu.core_type = #tpu.core_type<tc>, window_params = [{transform_indices = @transform_0, window_bounds = array<i64: 16, 32>}, {pipeline_mode = #tpu.pipeline_mode<synchronous>, transform_indices = @transform_1, window_bounds = array<i64: 32, 32>}, {pipeline_mode = #tpu.pipeline_mode<synchronous>, transform_indices = @transform_2, window_bounds = array<i64: 1, 32>}, {pipeline_mode = #tpu.pipeline_mode<synchronous>, transform_indices = @transform_3, window_bounds = array<i64: 1, 32>}, {transform_indices = @transform_4, window_bounds = array<i64: 2, 128>}]} {
    %c0 = arith.constant 0 : index
    %c0_0 = arith.constant 0 : index
    %0 = vector.load %arg1[%c0, %c0_0] : memref<16x32xf32, #tpu.memory_space<vmem>>, vector<16x32xf32>
    %c0_1 = arith.constant 0 : index
    %c0_2 = arith.constant 0 : index
    %1 = vector.load %arg2[%c0_1, %c0_2] : memref<32x32xf32, #tpu.memory_space<vmem>>, vector<32x32xf32>
    %cst = arith.constant dense<0.000000e+00> : vector<16x32xf32>
    %2 = tpu.matmul %0, %1, %cst {dimension_numbers = #tpu.dot_dimension_numbers<[1], [0], [0], [1], [0, 0, 1, 1], [], []>} : vector<16x32xf32>, vector<32x32xf32>, vector<16x32xf32> -> vector<16x32xf32>
    %c0_3 = arith.constant 0 : index
    %c0_4 = arith.constant 0 : index
    %3 = vector.load %arg3[%c0_3, %c0_4] : memref<1x32xf32, #tpu.memory_space<vmem>>, vector<1x32xf32>
    %c0_5 = arith.constant 0 : index
    %c0_6 = arith.constant 0 : index
    %4 = vector.load %arg4[%c0_5, %c0_6] : memref<1x32xf32, #tpu.memory_space<vmem>>, vector<1x32xf32>
    %5 = vector.shape_cast %2 : vector<16x32xf32> to vector<2x8x32xf32>
    %cst_7 = arith.constant dense<0.000000e+00> : vector<2x32xf32>
    %6 = vector.multi_reduction <add>, %5, %cst_7 [1] : vector<2x8x32xf32> to vector<2x32xf32>
    %7 = vector.shape_cast %6 : vector<2x32xf32> to vector<2x1x32xf32>
    %cst_8 = arith.constant 1.250000e-01 : f32
    %8 = vector.broadcast %cst_8 : f32 to vector<2x1x32xf32>
    %9 = arith.mulf %7, %8 : vector<2x1x32xf32>
    %10 = arith.mulf %5, %5 : vector<2x8x32xf32>
    %cst_9 = arith.constant dense<0.000000e+00> : vector<2x32xf32>
    %11 = vector.multi_reduction <add>, %10, %cst_9 [1] : vector<2x8x32xf32> to vector<2x32xf32>
    %12 = vector.shape_cast %11 : vector<2x32xf32> to vector<2x1x32xf32>
    %cst_10 = arith.constant 1.250000e-01 : f32
    %13 = vector.broadcast %cst_10 : f32 to vector<2x1x32xf32>
    %14 = arith.mulf %12, %13 : vector<2x1x32xf32>
    %15 = arith.mulf %9, %9 : vector<2x1x32xf32>
    %16 = arith.subf %14, %15 : vector<2x1x32xf32>
    %cst_11 = arith.constant 9.99999974E-6 : f32
    %17 = vector.broadcast %cst_11 : f32 to vector<2x1x32xf32>
    %18 = arith.addf %16, %17 : vector<2x1x32xf32>
    %19 = math.rsqrt %18 : vector<2x1x32xf32>
    %20 = vector.shape_cast %3 : vector<1x32xf32> to vector<1x1x32xf32>
    %21 = vector.broadcast %20 : vector<1x1x32xf32> to vector<2x1x32xf32>
    %22 = arith.mulf %21, %19 : vector<2x1x32xf32>
    %23 = arith.mulf %9, %22 : vector<2x1x32xf32>
    %24 = vector.shape_cast %4 : vector<1x32xf32> to vector<1x1x32xf32>
    %25 = vector.broadcast %24 : vector<1x1x32xf32> to vector<2x1x32xf32>
    %26 = arith.subf %25, %23 : vector<2x1x32xf32>
    %27 = vector.broadcast %22 : vector<2x1x32xf32> to vector<2x8x32xf32>
    %28 = arith.mulf %5, %27 : vector<2x8x32xf32>
    %29 = vector.broadcast %26 : vector<2x1x32xf32> to vector<2x8x32xf32>
    %30 = arith.addf %28, %29 : vector<2x8x32xf32>
    %31 = vector.shape_cast %30 : vector<2x8x32xf32> to vector<16x32xf32>
    %32 = vector.extract_strided_slice %31 {offsets = [0, 0], sizes = [16, 16], strides = [1, 1]} : vector<16x32xf32> to vector<16x16xf32>
    %33 = vector.extract_strided_slice %31 {offsets = [0, 16], sizes = [16, 16], strides = [1, 1]} : vector<16x32xf32> to vector<16x16xf32>
    %34 = arith.negf %33 : vector<16x16xf32>
    %35 = math.exp %34 : vector<16x16xf32>
    %cst_12 = arith.constant 1.000000e+00 : f32
    %36 = vector.broadcast %cst_12 : f32 to vector<16x16xf32>
    %37 = arith.addf %36, %35 : vector<16x16xf32>
    %38 = arith.divf %36, %37 : vector<16x16xf32>
    %39 = arith.mulf %32, %38 : vector<16x16xf32>
    %40 = vector.shape_cast %39 : vector<16x16xf32> to vector<2x128xf32>
    %c0_13 = arith.constant 0 : index
    %c0_14 = arith.constant 0 : index
    %41 = vector.load %arg5[%c0_13, %c0_14] : memref<2x128xf32, #tpu.memory_space<vmem>>, vector<2x128xf32>
    tpu.vector_store %arg5[%c0_13, %c0_14], %40 {strides = array<i32>} : memref<2x128xf32, #tpu.memory_space<vmem>>, vector<2x128xf32>,
    return
  }
  func.func @transform_0(%arg0: i32) -> (i32, i32) {
    %c0_i32 = arith.constant 0 : i32
    %c0_i32_0 = arith.constant 0 : i32
    return %arg0, %c0_i32 : i32, i32
  }
  func.func @transform_1(%arg0: i32) -> (i32, i32) {
    %c0_i32 = arith.constant 0 : i32
    %c0_i32_0 = arith.constant 0 : i32
    %c0_i32_1 = arith.constant 0 : i32
    return %c0_i32, %c0_i32_0 : i32, i32
  }
  func.func @transform_2(%arg0: i32) -> (i32, i32) {
    %c0_i32 = arith.constant 0 : i32
    %c0_i32_0 = arith.constant 0 : i32
    %c0_i32_1 = arith.constant 0 : i32
    return %c0_i32, %c0_i32_0 : i32, i32
  }
  func.func @transform_3(%arg0: i32) -> (i32, i32) {
    %c0_i32 = arith.constant 0 : i32
    %c0_i32_0 = arith.constant 0 : i32
    %c0_i32_1 = arith.constant 0 : i32
    return %c0_i32, %c0_i32_0 : i32, i32
  }
  func.func @transform_4(%arg0: i32) -> (i32, i32) {
    %c0_i32 = arith.constant 0 : i32
    %c0_i32_0 = arith.constant 0 : i32
    return %arg0, %c0_i32 : i32, i32
  }
}

module attributes {stable_mosaic.version = 11 : i64} {
  func.func @_glu_kernel_fused(%arg0: i32, %arg1: memref<16x32xf32, #tpu.memory_space<vmem>>, %arg2: memref<32x32xf32, #tpu.memory_space<vmem>>, %arg3: memref<1x32xf32, #tpu.memory_space<vmem>>, %arg4: memref<1x32xf32, #tpu.memory_space<vmem>>, %arg5: memref<16x16xf32, #tpu.memory_space<vmem>>) attributes {dimension_semantics = [#tpu.dimension_semantics<parallel>], iteration_bounds = array<i64: 1>, scalar_prefetch = 0 : i64, scratch_operands = 0 : i64, tpu.core_type = #tpu.core_type<tc>, window_params = [{transform_indices = @transform_0, window_bounds = array<i64: 16, 32>}, {pipeline_mode = #tpu.pipeline_mode<synchronous>, transform_indices = @transform_1, window_bounds = array<i64: 32, 32>}, {pipeline_mode = #tpu.pipeline_mode<synchronous>, transform_indices = @transform_2, window_bounds = array<i64: 1, 32>}, {pipeline_mode = #tpu.pipeline_mode<synchronous>, transform_indices = @transform_3, window_bounds = array<i64: 1, 32>}, {transform_indices = @transform_4, window_bounds = array<i64: 16, 16>}]} {
    %c0 = arith.constant 0 : index
    %c0_0 = arith.constant 0 : index
    %0 = vector.load %arg1[%c0, %c0_0] : memref<16x32xf32, #tpu.memory_space<vmem>>, vector<16x32xf32>
    %c0_1 = arith.constant 0 : index
    %c0_2 = arith.constant 0 : index
    %1 = vector.load %arg2[%c0_1, %c0_2] : memref<32x32xf32, #tpu.memory_space<vmem>>, vector<32x32xf32>
    %cst = arith.constant dense<0.000000e+00> : vector<16x32xf32>
    %2 = tpu.matmul %0, %1, %cst {dimension_numbers = #tpu.dot_dimension_numbers<[1], [0], [0], [1], [0, 0, 1, 1], [], []>} : vector<16x32xf32>, vector<32x32xf32>, vector<16x32xf32> -> vector<16x32xf32>
    %c0_3 = arith.constant 0 : index
    %c0_4 = arith.constant 0 : index
    %3 = vector.load %arg3[%c0_3, %c0_4] : memref<1x32xf32, #tpu.memory_space<vmem>>, vector<1x32xf32>
    %c0_5 = arith.constant 0 : index
    %c0_6 = arith.constant 0 : index
    %4 = vector.load %arg4[%c0_5, %c0_6] : memref<1x32xf32, #tpu.memory_space<vmem>>, vector<1x32xf32>
    %5 = vector.shape_cast %2 : vector<16x32xf32> to vector<2x8x32xf32>
    %cst_7 = arith.constant dense<0.000000e+00> : vector<2x32xf32>
    %6 = vector.multi_reduction <add>, %5, %cst_7 [1] : vector<2x8x32xf32> to vector<2x32xf32>
    %7 = vector.shape_cast %6 : vector<2x32xf32> to vector<2x1x32xf32>
    %cst_8 = arith.constant 1.250000e-01 : f32
    %8 = vector.broadcast %cst_8 : f32 to vector<2x1x32xf32>
    %9 = arith.mulf %7, %8 : vector<2x1x32xf32>
    %10 = arith.mulf %5, %5 : vector<2x8x32xf32>
    %cst_9 = arith.constant dense<0.000000e+00> : vector<2x32xf32>
    %11 = vector.multi_reduction <add>, %10, %cst_9 [1] : vector<2x8x32xf32> to vector<2x32xf32>
    %12 = vector.shape_cast %11 : vector<2x32xf32> to vector<2x1x32xf32>
    %cst_10 = arith.constant 1.250000e-01 : f32
    %13 = vector.broadcast %cst_10 : f32 to vector<2x1x32xf32>
    %14 = arith.mulf %12, %13 : vector<2x1x32xf32>
    %15 = arith.mulf %9, %9 : vector<2x1x32xf32>
    %16 = arith.subf %14, %15 : vector<2x1x32xf32>
    %cst_11 = arith.constant 9.99999974E-6 : f32
    %17 = vector.broadcast %cst_11 : f32 to vector<2x1x32xf32>
    %18 = arith.addf %16, %17 : vector<2x1x32xf32>
    %19 = math.rsqrt %18 : vector<2x1x32xf32>
    %20 = vector.shape_cast %3 : vector<1x32xf32> to vector<1x1x32xf32>
    %21 = vector.broadcast %20 : vector<1x1x32xf32> to vector<2x1x32xf32>
    %22 = arith.mulf %21, %19 : vector<2x1x32xf32>
    %23 = arith.mulf %9, %22 : vector<2x1x32xf32>
    %24 = vector.shape_cast %4 : vector<1x32xf32> to vector<1x1x32xf32>
    %25 = vector.broadcast %24 : vector<1x1x32xf32> to vector<2x1x32xf32>
    %26 = arith.subf %25, %23 : vector<2x1x32xf32>
    %27 = vector.broadcast %22 : vector<2x1x32xf32> to vector<2x8x32xf32>
    %28 = arith.mulf %5, %27 : vector<2x8x32xf32>
    %29 = vector.broadcast %26 : vector<2x1x32xf32> to vector<2x8x32xf32>
    %30 = arith.addf %28, %29 : vector<2x8x32xf32>
    %31 = vector.shape_cast %30 : vector<2x8x32xf32> to vector<16x32xf32>
    %32 = vector.extract_strided_slice %31 {offsets = [0, 0], sizes = [16, 16], strides = [1, 1]} : vector<16x32xf32> to vector<16x16xf32>
    %33 = vector.extract_strided_slice %31 {offsets = [0, 16], sizes = [16, 16], strides = [1, 1]} : vector<16x32xf32> to vector<16x16xf32>
    %34 = arith.negf %33 : vector<16x16xf32>
    %35 = math.exp %34 : vector<16x16xf32>
    %cst_12 = arith.constant 1.000000e+00 : f32
    %36 = vector.broadcast %cst_12 : f32 to vector<16x16xf32>
    %37 = arith.addf %36, %35 : vector<16x16xf32>
    %38 = arith.divf %36, %37 : vector<16x16xf32>
    %39 = arith.mulf %32, %38 : vector<16x16xf32>
    %c0_13 = arith.constant 0 : index
    %c0_14 = arith.constant 0 : index
    %40 = vector.load %arg5[%c0_13, %c0_14] : memref<16x16xf32, #tpu.memory_space<vmem>>, vector<16x16xf32>
    tpu.vector_store %arg5[%c0_13, %c0_14], %39 {strides = array<i32>} : memref<16x16xf32, #tpu.memory_space<vmem>>, vector<16x16xf32>,
    return
  }
  func.func @transform_0(%arg0: i32) -> (i32, i32) {
    %c0_i32 = arith.constant 0 : i32
    %c0_i32_0 = arith.constant 0 : i32
    return %arg0, %c0_i32 : i32, i32
  }
  func.func @transform_1(%arg0: i32) -> (i32, i32) {
    %c0_i32 = arith.constant 0 : i32
    %c0_i32_0 = arith.constant 0 : i32
    %c0_i32_1 = arith.constant 0 : i32
    return %c0_i32, %c0_i32_0 : i32, i32
  }
  func.func @transform_2(%arg0: i32) -> (i32, i32) {
    %c0_i32 = arith.constant 0 : i32
    %c0_i32_0 = arith.constant 0 : i32
    %c0_i32_1 = arith.constant 0 : i32
    return %c0_i32, %c0_i32_0 : i32, i32
  }
  func.func @transform_3(%arg0: i32) -> (i32, i32) {
    %c0_i32 = arith.constant 0 : i32
    %c0_i32_0 = arith.constant 0 : i32
    %c0_i32_1 = arith.constant 0 : i32
    return %c0_i32, %c0_i32_0 : i32, i32
  }
  func.func @transform_4(%arg0: i32) -> (i32, i32) {
    %c0_i32 = arith.constant 0 : i32
    %c0_i32_0 = arith.constant 0 : i32
    return %arg0, %c0_i32 : i32, i32
  }
}

</mosaic_0001>

<bundles_post_ra>
// kernel: tpu_custom_call.1
= control target key start
LH: loop header
LB: loop body
LE: loop exit
PB: predicated region body
PF: predicated region fallthrough
CT: control target
= control target key end

     0   :  { %9 = vsyncpa [#allocation3], 0  ;;  %s462_s0 = inlined_call_operand.hbm [shape: f32[16,32], index: 0, kind: input, shape index: {}]   ;;  %s463_s1 = inlined_call_operand.hbm [shape: f32[32,32], index: 1, kind: input, shape index: {}]   ;;  %s464_s2 = inlined_call_operand.vmem [shape: f32[1,32], index: 2, kind: input, shape index: {}]   ;;  %s465_s3 = inlined_call_operand.vmem [shape: f32[1,32], index: 3, kind: input, shape index: {}]   ;;  %s466_s4 = inlined_call_operand.hbm [shape: f32[16,16], index: 4, kind: output, shape index: {}]  }
   0x1   :  { %10 = vsyncpa [#allocation6], 0 }
   0x2   :  { %11 = vsyncpa [#allocation4], 0  ;;  %s374_s15 = smov [#allocation2]   ;;  %s302_s19 = scalar_lea.hbm %s462_s0, 256 }
   0x3   :  { %s17_s16 = sshll.u32 %s374_s15, 4  ;;  %p303_p0 = scmp.ne.s32.totalorder %s462_s0, %s302_s19  ;;  %s18_s16 = int_to_ptr.vmem [resolvable:$true] %s17_s16 }
   0x4   :  { %p306_p1 = scmp.lt.u32.totalorder %s302_s19, %s462_s0 }
   0x6   :  { %p308_p2 = pnand %p306_p1, %p303_p0 }
   0x8   :  { %311 = shalt.err (!%p308_p2)
}
   0x9   :  { %s312_s24 = scalar_lea.vmem %s18_s16, 256  ;;  %p317_p4 = scmp.lt.s32.totalorder %s18_s16, %s18_s16 }
   0xa   :  { %p313_p3 = scmp.ne.s32.totalorder %s18_s16, %s312_s24  ;;  %p318_p5 = scmp.lt.s32.totalorder %s312_s24, %s312_s24 }
   0xc   :  { %p319_p6 = por %p318_p5, %p317_p4 }
   0xe   :  { %p320_p7 = pnand %p319_p6, %p313_p3 }
  0x10   :  { %323 = shalt.err (!%p320_p7)
}
  0x11   :  { %s375_s25 = smov 128   ;;  %s376_s26 = smov 8  }
  0x12   :  { %23 = dma.hbm_to_vmem [thread:$0]  %s462_s0, 256, %s18_s16, [#allocation3], %s375_s25, %s375_s25, %s376_s26  }
  0x13   :  { %s377_s29 = smov [#allocation5]   ;;  %s324_s7 = scalar_lea.hbm %s463_s1, 512 }
  0x14   :  { %s29_s30 = sshll.u32 %s377_s29, 4  ;;  %p325_p8 = scmp.ne.s32.totalorder %s463_s1, %s324_s7  ;;  %s30_s30 = int_to_ptr.vmem [resolvable:$true] %s29_s30 }
  0x15   :  { %p328_p9 = scmp.lt.u32.totalorder %s324_s7, %s463_s1 }
  0x17   :  { %p330_p10 = pnand %p328_p9, %p325_p8 }
  0x19   :  { %333 = shalt.err (!%p330_p10)
}
  0x1a   :  { %s334_s12 = scalar_lea.vmem %s30_s30, 512  ;;  %p339_p12 = scmp.lt.s32.totalorder %s30_s30, %s30_s30 }
  0x1b   :  { %p335_p11 = scmp.ne.s32.totalorder %s30_s30, %s334_s12  ;;  %p340_p13 = scmp.lt.s32.totalorder %s334_s12, %s334_s12 }
  0x1d   :  { %p341_p0 = por %p340_p13, %p339_p12 }
  0x1f   :  { %p342_p1 = pnand %p341_p0, %p335_p11 }
  0x21   :  { %345 = shalt.err (!%p342_p1)
}
  0x22   :  { %35 = dma.hbm_to_vmem [thread:$0]  %s463_s1, 512, %s30_s30, [#allocation6], %s375_s25, %s375_s25, %s376_s26  }
  0x23   :  { %368 = dma.done.wait [#allocation3], 256  }
  0x24   :  { %369 = vsyncadd [#allocation3], 4294967040 }
  0x25   :  { %370 = dma.done.wait [#allocation6], 512  }
  0x26   :  { %371 = vsyncadd [#allocation6], 4294966784  ;;  %vm52_vm0 = vcmask 261120   ;;  %v48_v0 = vld [vmem:[#allocation5] sm:$0xff]  ;;  %v49_v1 = vld [vmem:[#allocation5 + $0x8] sm:$0xff]  ;;  %v186_v50 = vlaneseq  ;;  %vm234_vm1 = vcmask 130048  }
  0x27   :  { %v50_v2 = vld [vmem:[#allocation5 + $0x10] sm:$0xff]  ;;  %v276_v3 = vpack.c.bf16 %v49_v1, %v48_v0  ;;  %v51_v4 = vld [vmem:[#allocation5 + $0x18] sm:$0xff] }
  0x28   :  { %v46_v5 = vld [vmem:[#allocation2] sm:$0xff]  ;;  %v280_v6 = vpack.c.bf16 %v51_v4, %v50_v2  ;;  %v47_v7 = vld [vmem:[#allocation2 + $0x8] sm:$0xff]  ;;  %v187_v51 = vshrl.u32 %v186_v50, 7 }
  0x29   :  { %273 = vmatprep.mubr.msk.f32.mxu0 %vm52_vm0, %v46_v5  ;;  %277 = vmatprep.subr.bf16.mxu0 %v276_v3  ;;  %v134_v52 = vld [vmem:[%s464_s2] sm:$0x1]  ;;  %s378_s2 = smov 112  }
  0x2a   :  { %279 = vmatpush3.bf16.msra.mxu0 %v276_v3  ;;  %v188_v53 = vsub.s32 0, %v187_v51  ;;  %v135_v57 = vld [vmem:[%s465_s3] sm:$0x1]  ;;  %s379_s3 = smov [#allocation7]  }
  0x2b   :  { %281 = vmatprep.subr.bf16.mxu0 %v280_v6  ;;  %s242_s17 = sshll.u32 %s379_s3, 4  ;;  %s243_s17 = int_to_ptr.vmem [resolvable:$true] %s242_s17 }
  0x2c   :  { %s346_s18 = scalar_lea.vmem %s243_s17, 256  ;;  %p351_p3 = scmp.lt.s32.totalorder %s243_s17, %s243_s17 }
  0x2d   :  { %p347_p2 = scmp.ne.s32.totalorder %s243_s17, %s346_s18  ;;  %p352_p4 = scmp.lt.s32.totalorder %s346_s18, %s346_s18 }
  0x2e   :  { %283 = vmatpush3.bf16.msra.mxu0 %v280_v6 }
  0x2f   :  { %p353_p5 = por %p352_p4, %p351_p3 }
  0x31   :  { %274 = vmatmul.mubr.msk.f32.vlgmr.msra.gmra.mrb[0].mxu0 %vm52_vm0, %v47_v7  ;;  %p354_p6 = pnand %p353_p5, %p347_p2 }
 0x104   :  { %v275_v8 = vpop.f32.mrb[0].mxu0 }
 0x105   :  { %v143_v9 = vsel %vm52_vm0, %v275_v8, 0.0  ;;  %v153_v10 = vmul.f32 %v275_v8, %v275_v8  ;;  %v125_v11 = vpop.f32.mrb[1].mxu0 }
 0x106   :  { %v144_v12 = vrot.slane %v143_v9, 4  ;;  %v136_v13 = vsel %vm52_vm0, %v125_v11, 0.0  ;;  %v152_v14 = vmul.f32 %v125_v11, %v125_v11 }
 0x107   :  { %v161_v15 = vsel %vm52_vm0, %v153_v10, 0.0  ;;  %v137_v16 = vrot.slane %v136_v13, 4 }
 0x108   :  { %v145_v17 = vadd.f32 %v144_v12, %v143_v9  ;;  %v162_v18 = vrot.slane %v161_v15, 4  ;;  %v154_v19 = vsel %vm52_vm0, %v152_v14, 0.0 }
 0x109   :  { %v138_v20 = vadd.f32 %v137_v16, %v136_v13  ;;  %v155_v21 = vrot.slane %v154_v19, 4 }
 0x10a   :  { %v146_v22 = vrot.slane %v145_v17, 2  ;;  %v163_v23 = vadd.f32 %v162_v18, %v161_v15 }
 0x10b   :  { %v139_v24 = vrot.slane %v138_v20, 2  ;;  %v156_v25 = vadd.f32 %v155_v21, %v154_v19 }
 0x10c   :  { %v147_v26 = vadd.f32 %v146_v22, %v145_v17  ;;  %v164_v27 = vrot.slane %v163_v23, 2 }
 0x10d   :  { %v140_v28 = vadd.f32 %v139_v24, %v138_v20  ;;  %v157_v29 = vrot.slane %v156_v25, 2 }
 0x10e   :  { %v148_v30 = vrot.slane %v147_v26, 1  ;;  %v165_v31 = vadd.f32 %v164_v27, %v163_v23 }
 0x10f   :  { %v141_v32 = vrot.slane %v140_v28, 1  ;;  %v158_v33 = vadd.f32 %v157_v29, %v156_v25 }
 0x110   :  { %v149_v34 = vadd.f32 %v148_v30, %v147_v26  ;;  %v166_v35 = vrot.slane %v165_v31, 1 }
 0x111   :  { %v142_v36 = vadd.f32 %v141_v32, %v140_v28  ;;  %v159_v37 = vrot.slane %v158_v33, 1 }
 0x112   :  { %v151_v38 = vmul.f32 0.125, %v149_v34  ;;  %v167_v39 = vadd.f32 %v166_v35, %v165_v31 }
 0x113   :  { %v150_v40 = vmul.f32 0.125, %v142_v36  ;;  %v160_v41 = vadd.f32 %v159_v37, %v158_v33 }
 0x114   :  { %v169_v42 = vmul.f32 0.125, %v167_v39  ;;  %v171_v43 = vmul.f32 %v151_v38, %v151_v38 }
 0x115   :  { %v168_v44 = vmul.f32 0.125, %v160_v41  ;;  %v170_v45 = vmul.f32 %v150_v40, %v150_v40 }
 0x116   :  { %v173_v46 = vsub.f32 %v169_v42, %v171_v43 }
 0x117   :  { %v172_v47 = vsub.f32 %v168_v44, %v170_v45 }
 0x118   :  { %v175_v48 = vadd.f32 1e-05, %v173_v46 }
 0x119   :  { %v174_v49 = vadd.f32 1e-05, %v172_v47 }
 0x11a   :  { %290 = vrsqrt.f32 %v175_v48 }
 0x11b   :  { %292 = vrsqrt.f32 %v174_v49 }
 0x124   :  { %v291_v54 = vpop.eup %290 }
 0x125   :  { %v293_v55 = vpop.eup %292  ;;  %v179_v56 = vmul.f32 %v291_v54, %v134_v52 }
 0x126   :  { %v178_v58 = vmul.f32 %v293_v55, %v134_v52 }
 0x127   :  { %v181_v59 = vmul.f32 %v179_v56, %v151_v38  ;;  %v193_v60 = vrot.slane %v179_v56, %v188_v53 }
 0x128   :  { %v180_v61 = vmul.f32 %v178_v58, %v150_v40  ;;  %v189_v62 = vrot.slane %v178_v58, %v188_v53 }
 0x129   :  { %v183_v63 = vsub.f32 %v135_v57, %v181_v59  ;;  %v197_v1 = vmul.f32 %v275_v8, %v193_v60 }
 0x12a   :  { %v182_v0 = vsub.f32 %v135_v57, %v180_v61  ;;  %v196_v3 = vmul.f32 %v189_v62, %v125_v11 }
 0x12b   :  { %v207_v2 = vrot.slane %v183_v63, %v188_v53 }
 0x12c   :  { %v203_v4 = vrot.slane %v182_v0, %v188_v53 }
 0x12d   :  { %v211_v5 = vadd.f32 %v207_v2, %v197_v1 }
 0x12e   :  { %v210_v6 = vadd.f32 %v203_v4, %v196_v3 }
 0x12f   :  { %v258_v7 = vmul.f32 -1.442695, %v211_v5 }
 0x130   :  { %v257_v9 = vmul.f32 -1.442695, %v210_v6 }
 0x131   :  { %294 = vpow2.f32 %v258_v7 }
 0x132   :  { %296 = vpow2.f32 %v257_v9 }
 0x13b   :  { %v295_v10 = vpop.eup %294 }
 0x13c   :  { %v297_v12 = vpop.eup %296  ;;  %v219_v14 = vadd.f32 1.0, %v295_v10 }
 0x13d   :  { %v218_v13 = vadd.f32 1.0, %v297_v12 }
 0x13f   :  { %298 = vrcp.f32 %v218_v13 }
 0x140   :  { %300 = vrcp.f32 %v219_v14 }
 0x149   :  { %v299_v15 = vpop.eup %298 }
 0x14a   :  { %226 = vrot.lane.b32.xlu0 %v299_v15, %s378_s2  ;;  %v301_v16 = vpop.eup %300 }
 0x14e   :  { %228 = vrot.lane.b32.xlu0 %v301_v16, %s378_s2 }
 0x1bc   :  { %v227_v8 = vpop.permute.xlu0 %226 }
 0x1bd   :  { %v232_v11 = vmul.f32 %v227_v8, %v210_v6 }
 0x1bf   :  { %235 = vst.msk [vmem:[#allocation7] sm:$0xff] %vm234_vm1, %v232_v11 }
 0x1c0   :  { %v229_v17 = vpop.permute.xlu0 %228 }
 0x1c1   :  { %v233_v18 = vmul.f32 %v229_v17, %v211_v5 }
 0x1c3   :  { %236 = vst.msk [vmem:[#allocation7 + $0x8] sm:$0xff] %vm234_vm1, %v233_v18 }
 0x1c4   :  { %357 = shalt.err (!%p354_p6)
}
 0x1c5   :  { %s358_s21 = scalar_lea.hbm %s466_s4, 256 }
 0x1c6   :  { %p359_p7 = scmp.ne.s32.totalorder %s466_s4, %s358_s21  ;;  %p362_p8 = scmp.lt.u32.totalorder %s358_s21, %s466_s4 }
 0x1c8   :  { %p364_p9 = pnand %p362_p8, %p359_p7 }
 0x1ca   :  { %367 = shalt.err (!%p364_p9)
}
 0x1cb   :  { %248 = dma.vmem_to_hbm [thread:$0]  %s243_s17, 256, %s466_s4, [#allocation4], %s375_s25, %s375_s25, %s376_s26  }
 0x1cc   :  { %372 = dma.done.wait [#allocation4], 256  }
 0x1cd   :  { %373 = vsyncadd [#allocation4], 4294967040 }
 0x1ce   :  { %252 = vsyncpa [#allocation3], 1 }
 0x1cf   :  { %253 = vsyncpa [#allocation6], 1 }
 0x1d0   :  { %254 = vsyncpa [#allocation4], 1 }

</bundles_post_ra>
